<compile_context>
chip_gen: v5e
topology: v5e:2x2
jax: 0.10.0
libtpu: 0.0.40
codegen_flags: <defaults>
</compile_context>

<pallas_src>
import functools

import numpy as np
import jax
import jax.numpy as jnp
from jax.experimental import pallas as pl
from jax.experimental.pallas import tpu as pltpu


@functools.lru_cache(maxsize=None)
def _bilinear_matrix(out_size: int, in_size: int) -> np.ndarray:
    """Interpolation matrix A (out,in) so that y = A @ x matches
    F.interpolate(mode='bilinear', align_corners=False) along one axis."""
    A = np.zeros((out_size, in_size), dtype=np.float32)
    scale = in_size / out_size
    for i in range(out_size):
        src = (i + 0.5) * scale - 0.5
        src = max(src, 0.0)
        i0 = min(int(np.floor(src)), in_size - 1)
        i1 = min(i0 + 1, in_size - 1)
        frac = src - i0
        A[i, i0] += 1.0 - frac
        A[i, i1] += frac
    return A


@functools.lru_cache(maxsize=None)
def _banded_upsample_operator(h, w, H, W, tile_h):
    """Per-H-tile band-limited bilinear operator.

    Returns:
      ops   : (nH, band_h*w, tile_h*W) f32, ops[j] maps the banded x slice for
              tile j (flattened spatial) to the tile's flattened output.
      starts: tuple of nH ints, first source row of each band.
      band_h: band height (same for all tiles).
    """
    Ah = _bilinear_matrix(H, h)   # (H, h)
    Aw = _bilinear_matrix(W, w)   # (W, w)
    nH = H // tile_h
    lo, hi = [], []
    for j in range(nH):
        rows = Ah[j * tile_h:(j + 1) * tile_h]             # (tile_h, h)
        cols = np.nonzero(np.any(rows != 0.0, axis=0))[0]
        lo.append(int(cols.min()))
        hi.append(int(cols.max()))
    band_h = min(h, max(hj - lj + 1 for lj, hj in zip(lo, hi)))
    starts = tuple(min(lj, h - band_h) for lj in lo)
    ops = np.zeros((nH, band_h * w, tile_h * W), dtype=np.float32)
    for j, s in enumerate(starts):
        sub = Ah[j * tile_h:(j + 1) * tile_h, s:s + band_h]   # (tile_h, band_h)
        ops[j] = np.kron(sub, Aw).T                           # (band_h*w, tile_h*W)
    return ops, starts, band_h


def fpn_block_kernel(xb_ref, skip_ref, up_op_ref, wf_ref, bias_ref, out_ref):
    """One (H-tile, batch) grid step.

    Block shapes:
      xb_ref   : (1, 1, Cp, band_h*w)  banded coarse input feeding this H tile
      skip_ref : (1, Cs, tH*W)         skip tile, spatial flattened (lane dense)
      up_op_ref: (1, band_h*w, tH*W)   banded bilinear operator for this H tile
      wf_ref   : (Cp, Cs)              1x1 conv weight with BN scale folded in
      bias_ref : (Cp, 1)               folded BN bias (f32)
      out_ref  : (1, Cp, tH*W)
    """
    cdt = wf_ref.dtype
    # --- skip branch: 1x1 conv (+ folded eval-mode BN) + ReLU ----------------
    # In-kernel cast to the compute dtype (free VPU op hidden under DMA),
    # one collapsed (Cp,Cs)@(Cs,tH*W) MXU matmul, f32 accumulation.
    conv = jnp.dot(wf_ref[...], skip_ref[0].astype(cdt),
                   preferred_element_type=jnp.float32)
    y = jnp.maximum(conv + bias_ref[...], 0.0)                 # (Cp, tH*W) f32

    # --- upsample branch: banded bilinear operator, one 2D matmul ------------
    # (Cp, band_h*w) @ (band_h*w, tH*W); result is already in the output layout.
    up = jnp.dot(xb_ref[0, 0], up_op_ref[0], preferred_element_type=jnp.float32)

    out_ref[0] = (up + y).astype(out_ref.dtype)


def _default_vmem_limit_bytes():
    """~75% of physical VMEM: ~96 MiB on v5e/v6e (128 MiB), ~48 MiB on v7x (64 MiB)."""
    try:
        cap = getattr(pltpu.get_tpu_info(), "vmem_capacity_bytes", None)
        if cap:
            return int(cap) * 3 // 4
    except Exception:
        pass
    return 48 * 1024 * 1024   # safe on every generation


def _pick_tile_h(H, W, h, w, Cs, Cp, skip_isz, out_isz, cdt_isz, budget_bytes,
                 prefer_min_tiles=1):
    """Largest H tile whose per-step working set (double-buffered blocks plus
    live f32 epilogue temporaries) fits the budget and whose flattened width
    (tH*W) is a multiple of 128 (or the full extent)."""

    def band(t):   # conservative upper bound on the source-row band height
        return min(h, int(np.ceil(t * h / H)) + 2)

    def step_bytes(t):
        blk = t * W
        return (2 * Cs * blk * skip_isz                 # skip block
                + 2 * Cp * blk * out_isz                # out block
                + 2 * band(t) * w * blk * cdt_isz       # banded operator block
                + 2 * Cp * band(t) * w * cdt_isz        # banded x block
                + 2 * (Cp * Cs * cdt_isz + Cp * 4)      # weight + bias
                + 3 * Cp * blk * 4)                     # live f32 temps (conv/up/sum)

    legal = [t for t in range(1, H + 1)
             if H % t == 0 and (t == H or (t * W) % 128 == 0)]
    for min_tiles in (prefer_min_tiles, 1):
        fit = [t for t in legal if (H // t) >= min_tiles
               and step_bytes(t) <= budget_bytes]
        if fit:
            return max(fit)
    return min(legal)   # best effort: smallest legal tile even if over budget


def fpn_block(x, skip, conv_w, bn_gamma, bn_beta, bn_mean, bn_var, eps=1e-5,
              compute_dtype=jnp.bfloat16, out_dtype=None, tile_h=None,
              vmem_limit_bytes=None, skip_buffers=None):
    N, Cp, h, w = x.shape
    Ns, Cs, H, W = skip.shape
    assert N == Ns and conv_w.shape == (Cp, Cs) and Cs > 0
    out_dtype = x.dtype if out_dtype is None else out_dtype
    if vmem_limit_bytes is None:
        vmem_limit_bytes = _default_vmem_limit_bytes()

    cdt = jnp.dtype(compute_dtype)
    skip_isz = jnp.dtype(skip.dtype).itemsize
    out_isz = jnp.dtype(out_dtype).itemsize

    if tile_h is None:
        # When N==1 prefer >=2 H tiles so both v7x TensorCores get a grid step.
        tile_h = _pick_tile_h(H, W, h, w, Cs, Cp, skip_isz, out_isz, cdt.itemsize,
                              (vmem_limit_bytes * 3) // 4,
                              prefer_min_tiles=2 if N == 1 else 1)
    assert H % tile_h == 0 and (tile_h == H or (tile_h * W) % 128 == 0)
    nH = H // tile_h

    # --- host-side glue (operator construction cached on static shapes) ------
    ops_np, starts, band_h = _banded_upsample_operator(h, w, H, W, tile_h)
    up_op = jnp.asarray(ops_np, dtype=cdt)                    # (nH, band_h*w, tH*W)

    # Fold eval-mode BatchNorm into the bias-free 1x1 conv.
    bn_scale = bn_gamma / jnp.sqrt(bn_var + eps)                     # (Cp,)
    w_folded = (conv_w * bn_scale[:, None]).astype(cdt)              # (Cp, Cs)
    bias = (bn_beta - bn_mean * bn_scale).reshape(Cp, 1).astype(jnp.float32)

    # Banded coarse input per H tile (tiny).  skip stays in its input dtype in
    # HBM and is cast inside the kernel - no extra host conversion pass.
    xb = jnp.stack([x[:, :, s:s + band_h, :].reshape(N, Cp, band_h * w)
                    for s in starts], axis=0).astype(cdt)    # (nH, N, Cp, band_h*w)
    skip_flat = skip.reshape(N, Cs, H * W)

    skip_spec_kwargs = {}
    if skip_buffers is not None:   # optional deeper pipelining once HBM-streaming
        skip_spec_kwargs["pipeline_mode"] = pl.Buffered(skip_buffers)
    skip_spec = pl.BlockSpec((1, Cs, tile_h * W), lambda j, n: (n, 0, j),
                             **skip_spec_kwargs)

    out_flat = pl.pallas_call(
        fpn_block_kernel,
        out_shape=jax.ShapeDtypeStruct((N, Cp, H * W), out_dtype),
        grid_spec=pltpu.PrefetchScalarGridSpec(
            num_scalar_prefetch=0,
            # H-tile outer, batch inner: each operator/x-band slab is DMA'd
            # once, not once per batch element.
            grid=(nH, N),
            in_specs=[
                pl.BlockSpec((1, 1, Cp, band_h * w), lambda j, n: (j, n, 0, 0)),
                skip_spec,
                pl.BlockSpec((1, band_h * w, tile_h * W), lambda j, n: (j, 0, 0)),
                pl.BlockSpec((Cp, Cs), lambda j, n: (0, 0)),
                pl.BlockSpec((Cp, 1), lambda j, n: (0, 0)),
            ],
            out_specs=pl.BlockSpec((1, Cp, tile_h * W), lambda j, n: (n, 0, j)),
        ),
        compiler_params=pltpu.CompilerParams(
            dimension_semantics=("parallel", "parallel"),
            vmem_limit_bytes=int(vmem_limit_bytes),
        ),
    )(xb, skip_flat, up_op, w_folded, bias)

    return out_flat.reshape(N, Cp, H, W)


def fpn_block_reference(x, skip, conv_w, bn_gamma, bn_beta, bn_mean, bn_var, eps=1e-5):
    """Plain-JAX f32 reference with identical math (no folding) for validation."""
    _, _, H, W = skip.shape
    _, _, h, w = x.shape
    Ah = jnp.asarray(_bilinear_matrix(H, h))
    Aw = jnp.asarray(_bilinear_matrix(W, w))
    up = jnp.einsum("Hh,nchw,Ww->ncHW", Ah, x, Aw)
    conv = jnp.einsum("oc,nchw->nohw", conv_w, skip)
    bn = (conv - bn_mean[None, :, None, None]) / jnp.sqrt(
        bn_var + eps)[None, :, None, None] * bn_gamma[None, :, None, None] \
        + bn_beta[None, :, None, None]
    return up + jnp.maximum(bn, 0.0)


if __name__ == "__main__":
    # Small, deterministic example consistent with FPNBlock:
    #   skip_channels=4, pyramid_channels=8, x is the coarser pyramid level.
    N, Cp, Cs = 2, 8, 4
    h, w = 8, 8          # spatial size of x (coarse level)
    H, W = 16, 16        # spatial size of skip (fine level, upsample target)

    key = jax.random.PRNGKey(0)
    kx, ks, kw, kg, kb, km, kv = jax.random.split(key, 7)
    x = jax.random.normal(kx, (N, Cp, h, w), dtype=jnp.float32)
    skip = jax.random.normal(ks, (N, Cs, H, W), dtype=jnp.float32)
    conv_w = jax.random.normal(kw, (Cp, Cs), dtype=jnp.float32) * 0.1
    bn_gamma = jax.random.uniform(kg, (Cp,), minval=0.5, maxval=1.5)
    bn_beta = jax.random.normal(kb, (Cp,), dtype=jnp.float32) * 0.1
    bn_mean = jax.random.normal(km, (Cp,), dtype=jnp.float32) * 0.1
    bn_var = jax.random.uniform(kv, (Cp,), minval=0.5, maxval=1.5)

    ref = fpn_block_reference(x, skip, conv_w, bn_gamma, bn_beta, bn_mean, bn_var)

    # f32 path, auto tile (single full-H tile): exact algorithm check.
    out_f32 = jax.block_until_ready(
        fpn_block(x, skip, conv_w, bn_gamma, bn_beta, bn_mean, bn_var,
                  compute_dtype=jnp.float32))
    assert out_f32.shape == (N, Cp, H, W)
    np.testing.assert_allclose(np.asarray(out_f32), np.asarray(ref),
                               atol=1e-4, rtol=1e-4)

    # f32 path with forced H tiling: exercises the banded operator and the
    # (H-tile outer, batch inner) grid.
    out_tiled = jax.block_until_ready(
        fpn_block(x, skip, conv_w, bn_gamma, bn_beta, bn_mean, bn_var,
                  compute_dtype=jnp.float32, tile_h=8))
    np.testing.assert_allclose(np.asarray(out_tiled), np.asarray(ref),
                               atol=1e-4, rtol=1e-4)

    # Default bf16-MXU path: looser tolerance for bf16 operand rounding.
    out_bf16 = jax.block_until_ready(
        fpn_block(x, skip, conv_w, bn_gamma, bn_beta, bn_mean, bn_var))
    assert out_bf16.shape == (N, Cp, H, W)
    np.testing.assert_allclose(np.asarray(out_bf16), np.asarray(ref),
                               atol=3e-2, rtol=3e-2)

    print("KERNEL_OK")
</pallas_src>

<mosaic_0001>
module attributes {stable_mosaic.version = 11 : i64} {
  func.func @fpn_block_kernel(%arg0: i32, %arg1: i32, %arg2: memref<1x1x8x64xf32, #tpu.memory_space<vmem>>, %arg3: memref<1x4x256xf32, #tpu.memory_space<vmem>>, %arg4: memref<1x64x256xf32, #tpu.memory_space<vmem>>, %arg5: memref<8x4xf32, #tpu.memory_space<vmem>>, %arg6: memref<8x1xf32, #tpu.memory_space<vmem>>, %arg7: memref<1x8x256xf32, #tpu.memory_space<vmem>>) attributes {dimension_semantics = [#tpu.dimension_semantics<parallel>, #tpu.dimension_semantics<parallel>], iteration_bounds = array<i64: 1, 2>, scalar_prefetch = 0 : i64, scratch_operands = 0 : i64, tpu.core_type = #tpu.core_type<tc>, window_params = [{transform_indices = @transform_0, window_bounds = array<i64: 1, 1, 8, 64>}, {transform_indices = @transform_1, window_bounds = array<i64: 1, 4, 256>}, {transform_indices = @transform_2, window_bounds = array<i64: 1, 64, 256>}, {pipeline_mode = #tpu.pipeline_mode<synchronous>, transform_indices = @transform_3, window_bounds = array<i64: 8, 4>}, {pipeline_mode = #tpu.pipeline_mode<synchronous>, transform_indices = @transform_4, window_bounds = array<i64: 8, 1>}, {transform_indices = @transform_5, window_bounds = array<i64: 1, 8, 256>}]} {
    %c0 = arith.constant 0 : index
    %c0_0 = arith.constant 0 : index
    %0 = vector.load %arg5[%c0, %c0_0] : memref<8x4xf32, #tpu.memory_space<vmem>>, vector<8x4xf32>
    %c0_1 = arith.constant 0 : index
    %c0_2 = arith.constant 0 : index
    %c0_3 = arith.constant 0 : index
    %1 = vector.load %arg3[%c0_1, %c0_2, %c0_3] : memref<1x4x256xf32, #tpu.memory_space<vmem>>, vector<1x4x256xf32>
    %2 = vector.shape_cast %1 : vector<1x4x256xf32> to vector<4x256xf32>
    %cst = arith.constant dense<0.000000e+00> : vector<8x256xf32>
    %3 = tpu.matmul %0, %2, %cst {dimension_numbers = #tpu.dot_dimension_numbers<[1], [0], [0], [1], [0, 0, 1, 1], [], []>} : vector<8x4xf32>, vector<4x256xf32>, vector<8x256xf32> -> vector<8x256xf32>
    %c0_4 = arith.constant 0 : index
    %c0_5 = arith.constant 0 : index
    %4 = vector.load %arg6[%c0_4, %c0_5] : memref<8x1xf32, #tpu.memory_space<vmem>>, vector<8x1xf32>
    %5 = vector.broadcast %4 : vector<8x1xf32> to vector<8x256xf32>
    %6 = arith.addf %3, %5 : vector<8x256xf32>
    %cst_6 = arith.constant 0.000000e+00 : f32
    %7 = vector.broadcast %cst_6 : f32 to vector<8x256xf32>
    %8 = arith.maximumf %6, %7 : vector<8x256xf32>
    %c0_7 = arith.constant 0 : index
    %c0_8 = arith.constant 0 : index
    %c0_9 = arith.constant 0 : index
    %c0_10 = arith.constant 0 : index
    %9 = vector.load %arg2[%c0_7, %c0_8, %c0_9, %c0_10] : memref<1x1x8x64xf32, #tpu.memory_space<vmem>>, vector<1x1x8x64xf32>
    %10 = vector.shape_cast %9 : vector<1x1x8x64xf32> to vector<8x64xf32>
    %c0_11 = arith.constant 0 : index
    %c0_12 = arith.constant 0 : index
    %c0_13 = arith.constant 0 : index
    %11 = vector.load %arg4[%c0_11, %c0_12, %c0_13] : memref<1x64x256xf32, #tpu.memory_space<vmem>>, vector<1x64x256xf32>
    %12 = vector.shape_cast %11 : vector<1x64x256xf32> to vector<64x256xf32>
    %cst_14 = arith.constant dense<0.000000e+00> : vector<8x256xf32>
    %13 = tpu.matmul %10, %12, %cst_14 {dimension_numbers = #tpu.dot_dimension_numbers<[1], [0], [0], [1], [0, 0, 1, 1], [], []>} : vector<8x64xf32>, vector<64x256xf32>, vector<8x256xf32> -> vector<8x256xf32>
    %14 = arith.addf %13, %8 : vector<8x256xf32>
    %c0_15 = arith.constant 0 : index
    %c0_16 = arith.constant 0 : index
    %c0_17 = arith.constant 0 : index
    %15 = vector.load %arg7[%c0_15, %c0_16, %c0_17] : memref<1x8x256xf32, #tpu.memory_space<vmem>>, vector<1x8x256xf32>
    %16 = vector.shape_cast %15 : vector<1x8x256xf32> to vector<8x256xf32>
    %17 = vector.shape_cast %14 : vector<8x256xf32> to vector<1x8x256xf32>
    tpu.vector_store %arg7[%c0_15, %c0_16, %c0_17], %17 {strides = array<i32>} : memref<1x8x256xf32, #tpu.memory_space<vmem>>, vector<1x8x256xf32>,
    return
  }
  func.func @transform_0(%arg0: i32, %arg1: i32) -> (i32, i32, i32, i32) {
    %c0_i32 = arith.constant 0 : i32
    %c0_i32_0 = arith.constant 0 : i32
    %c0_i32_1 = arith.constant 0 : i32
    return %arg0, %arg1, %c0_i32, %c0_i32_0 : i32, i32, i32, i32
  }
  func.func @transform_1(%arg0: i32, %arg1: i32) -> (i32, i32, i32) {
    %c0_i32 = arith.constant 0 : i32
    %c0_i32_0 = arith.constant 0 : i32
    return %arg1, %c0_i32, %arg0 : i32, i32, i32
  }
  func.func @transform_2(%arg0: i32, %arg1: i32) -> (i32, i32, i32) {
    %c0_i32 = arith.constant 0 : i32
    %c0_i32_0 = arith.constant 0 : i32
    %c0_i32_1 = arith.constant 0 : i32
    return %arg0, %c0_i32, %c0_i32_0 : i32, i32, i32
  }
  func.func @transform_3(%arg0: i32, %arg1: i32) -> (i32, i32) {
    %c0_i32 = arith.constant 0 : i32
    %c0_i32_0 = arith.constant 0 : i32
    %c0_i32_1 = arith.constant 0 : i32
    return %c0_i32, %c0_i32_0 : i32, i32
  }
  func.func @transform_4(%arg0: i32, %arg1: i32) -> (i32, i32) {
    %c0_i32 = arith.constant 0 : i32
    %c0_i32_0 = arith.constant 0 : i32
    %c0_i32_1 = arith.constant 0 : i32
    return %c0_i32, %c0_i32_0 : i32, i32
  }
  func.func @transform_5(%arg0: i32, %arg1: i32) -> (i32, i32, i32) {
    %c0_i32 = arith.constant 0 : i32
    %c0_i32_0 = arith.constant 0 : i32
    return %arg1, %c0_i32, %arg0 : i32, i32, i32
  }
}

</mosaic_0001>

<bundles_post_ra>
// kernel: tpu_custom_call.1
= control target key start
LH: loop header
LB: loop body
LE: loop exit
PB: predicated region body
PF: predicated region fallthrough
CT: control target
= control target key end

     0   :  { %10 = vsyncpa [#allocation3], 0  ;;  %s1018_s0 = inlined_call_operand.vmem [shape: f32[1,2,8,64], index: 0, kind: input, shape index: {}]   ;;  %s1019_s1 = inlined_call_operand.hbm [shape: f32[2,4,256], index: 1, kind: input, shape index: {}]   ;;  %s1020_s2 = inlined_call_operand.hbm [shape: f32[1,64,256], index: 2, kind: input, shape index: {}]   ;;  %s1021_s3 = inlined_call_operand.vmem [shape: f32[8,4], index: 3, kind: input, shape index: {}]   ;;  %s1022_s4 = inlined_call_operand.vmem [shape: f32[8,1], index: 4, kind: input, shape index: {}]   ;;  %s1023_s5 = inlined_call_operand.hbm [shape: f32[2,8,256], index: 5, kind: output, shape index: {}]  }
   0x1   :  { %12 = vsyncpa [#allocation3 + $0x1], 0 }
   0x2   :  { %13 = vsyncpa [#allocation6], 0 }
   0x3   :  { %14 = vsyncpa [#allocation4], 0 }
   0x4   :  { %16 = vsyncpa [#allocation4 + $0x1], 0  ;;  %s863_s18 = smov 0   ;;  %s865_s19 = smov 0  }
   0x5   :  { %s867_s20 = smov 0   ;;  %s869_s21 = smov 0  }
   0x6   :  { %s871_s22 = smov 0   ;;  %s873_s23 = smov 0  }
   0x7 LB: > { %s578_s24 = sadd.s32 4294967295, %s827_s23   ;;  %p580_p0 = scmp.ge.s32.totalorder %s827_s23, 1  ;;  %s827_s23 = sphi %s873_s23, %s22_s23   ;;  %s823_s22 = sphi %s871_s22, %s1034_s22   ;;  %s819_s21 = sphi %s869_s21, %s1033_s21   ;;  %s815_s20 = sphi %s867_s20, %s1032_s20   ;;  %s811_s19 = sphi %s865_s19, %s1031_s19   ;;  %s807_s18 = sphi %s863_s18, %s1030_s18  }
   0x8   : > { %p895_p1 = scmp.eq.s32.totalorder %s578_s24, 0  ;;  %p191_p2 = scmp.lt.s32.totalorder %s827_s23, 3 }
   0x9   : > { %s205_s28 = sshll.u32 %s1020_s2, 4  ;;  %s829_s30 = smov [#allocation5]   ;;  %s206_s28 = int_to_ptr.hbm [resolvable:$true] %s205_s28 }
   0xa   : > { %p903_p3 = pnand %p580_p0, %p191_p2  ;;  %s207_s6 = sshll.u32 %s829_s30, 4  ;;  %s208_s6 = int_to_ptr.vmem [resolvable:$true] %s207_s6 }
   0xb   : > { %p582_p6 = scmp.ge.s32.totalorder %s827_s23, 2  ;;  %s830_s7 = smov 256  }
   0xc   : > { %p612_p4 = pneg %p903_p3  ;;  %s831_s8 = smov 16  }
   0xd   : > { %s579_s9 = sadd.s32 4294967294, %s827_s23   ;;  %s31_s10 = sadd.s32 1, %s823_s22 }
   0xe   : > { %p613_p5 = pnand %p612_p4, %p895_p1  ;;  %s71_s11 = sadd.s32 1, %s815_s20 }
   0xf   : > { %p32_p7 = scmp.ge.s32.totalorder %s31_s10, 2  ;;  %p78_p8 = scmp.ne.s32.totalorder %s815_s20, %s811_s19 }
  0x10   : > { %615 = dma.hbm_to_vmem [thread:$0]  (!%p613_p5), %s206_s28, 2048, %s208_s6, [#allocation6], %s830_s7, %s830_s7, %s831_s8  }
  0x11   : > { %p79_p9 = scmp.eq.s32.totalorder %s827_s23, 0  ;;  %p84_p10 = scmp.ne.s32.totalorder %s811_s19, %s807_s18 }
  0x12   : > { %s1036_s10 = smov (%p32_p7, %s31_s10), 0  ;;  %p178_p13 = scmp.eq.s32.totalorder %s578_s24, 1 }
  0x13   : > { %p922_p11 = por %p79_p9, %p78_p8  ;;  %p928_p12 = por %p895_p1, %p84_p10 }
  0x14   : > { %s66_s14 = ssub.s32 %s823_s22, %s1036_s10  ;;  %p184_p2 = scmp.eq.s32.totalorder %s579_s9, 1 }
  0x15   : > { %p69_p0 = scmp.eq.s32.totalorder %s66_s14, 0  ;;  %p934_p4 = por %p178_p13, %p78_p8 }
  0x16   : > { %p625_p5 = scmp.lt.s32.totalorder %s827_s23, 2  ;;  %p942_p7 = por %p184_p2, %p84_p10 }
  0x17   : > { %s940_s16 = scalar_select %p69_p0, %s815_s20, %s71_s11  }
  0x18   : > { %s238_s26 = sand.u32 1, %s815_s20   ;;  %s602_s28 = sshll.u32 %s823_s22, 3 }
  0x19   : > { %s583_s27 = sshll.u32 %s238_s26, 3  ;;  %s249_s24 = scalar_lea.hbm %s1019_s1, %s602_s28 }
  0x1a   : > { %s242_s7 = scalar_lea.vmem [#allocation2], %s583_s27  ;;  %s251_s9 = sshll.u32 %s249_s24, 4  ;;  %s252_s9 = int_to_ptr.hbm [resolvable:$true] %s251_s9 }
  0x1b   : > { %s253_s8 = sshll.u32 %s242_s7, 4  ;;  %p617_p8 = pnand %p625_p5, %p922_p11  ;;  %s254_s8 = int_to_ptr.vmem [resolvable:$true] %s253_s8 }
  0x1c   : > { %s239_s11 = scalar_lea.sflag [#allocation3], %s238_s26  ;;  %262 = sbr.rel (%p903_p3) target bundleno = 190 (0xbe), region = 40 }
  0x1d   : > { %619 = dma.hbm_to_vmem [thread:$0]  (!%p617_p8), %s252_s9, 128, %s254_s8, %s239_s11  }
  0x1e   : > { %s956_s14 = sand.u32 (!%p903_p3), 1, %s811_s19  }
  0x1f   : > { %s587_s30 = sshll.u32 (!%p903_p3), %s956_s14, 3  ;;  %s265_s28 = scalar_lea.sflag (!%p903_p3), [#allocation3], %s956_s14 }
  0x20   : > { %s268_s27 = scalar_lea.vmem (!%p903_p3), [#allocation2], %s587_s30 }
  0x21   : > { %794 = dma.done.wait (%p928_p12), %s265_s28, 128  }
  0x22   : > { %796 = vsyncadd (%p928_p12), %s265_s28, 4294967168 }
  0x23   : > { %798 = dma.done.wait (%p895_p1), [#allocation6], 2048  }
  0x24   : > { %800 = vsyncadd (%p895_p1), [#allocation6], 4294965248  ;;  %v832_v0 = vmov 0   ;;  %p311_p3 = scmp.lt.s32.totalorder %s819_s21, 1  ;;  %v397_v1 = vld [vmem:[#allocation5 + $0x70] sm:$0xff]  ;;  %v398_v2 = vld [vmem:[#allocation5 + $0x78] sm:$0xff] }
  0x25   : > { %680 = vset.pattern.permute.xlu0 %v832_v0  ;;  %v395_v3 = vld [vmem:[#allocation5 + $0x60] sm:$0xff]  ;;  %411 = vmatpush.msra.mxu2 %v397_v1  ;;  %v396_v4 = vld [vmem:[#allocation5 + $0x68] sm:$0xff]  ;;  %v393_v5 = vld [vmem:[#allocation5 + $0x50] sm:$0xff]  ;;  %vm335_vm0 = vcmask 1043456   ;;  %vm399_vm1 = vcmask 523264   ;;  %vm331_vm2 = vcmask 31744  }
  0x26   : > { %431 = vmatpush.msra.mxu3 %v398_v2  ;;  %v394_v6 = vld [vmem:[#allocation5 + $0x58] sm:$0xff]  ;;  %s312_s29 = scalar_select %p311_p3, %s819_s21, 1  ;;  %v391_v7 = vld [vmem:[#allocation5 + $0x40] sm:$0xff]  ;;  %v392_v8 = vld [vmem:[#allocation5 + $0x48] sm:$0xff] }
  0x27   : > { %412 = vmatpush.msra.mxu2 %v395_v3  ;;  %v320_v9 = vld [vmem:[%s268_s27] sm:$0xff]  ;;  %v321_v12 = vld [vmem:[%s1022_s4] sm:$0xff]  ;;  %v387_v13 = vld [vmem:[#allocation5 + $0x20] sm:$0xff]  ;;  %s589_s9 = sshll.u32 %s956_s14, 4  ;;  %s603_s11 = sshll.u32 %s819_s21, 4 }
  0x28   : > { %432 = vmatpush.msra.mxu3 %v396_v4  ;;  %v389_v10 = vld [vmem:[#allocation5 + $0x30] sm:$0xff]  ;;  %v390_v11 = vld [vmem:[#allocation5 + $0x38] sm:$0xff]  ;;  %s590_s25 = sshll.u32 %s312_s29, 3  ;;  %328 = vst [vmem:[#allocation1] ss:$2 sm:$0xff] %v320_v9  ;;  %v388_v14 = vld [vmem:[#allocation5 + $0x28] sm:$0xff]  ;;  %324 = vperm.xlu0 %680, %v321_v12   ;;  %s459_s27 = scalar_lea.hbm %s1023_s5, %s603_s11 }
  0x29   : > { %413 = vmatpush.msra.mxu2 %v393_v5  ;;  %s316_s24 = scalar_lea.vmem %s1018_s0, %s590_s25  ;;  %v385_v15 = vld [vmem:[#allocation5 + $0x10] sm:$0xff]  ;;  %v386_v16 = vld [vmem:[#allocation5 + $0x18] sm:$0xff]  ;;  %v383_v17 = vld [vmem:[#allocation5] sm:$0xff]  ;;  %s308_s29 = scalar_lea.vmem [#allocation7], %s589_s9 }
  0x2a   : > { %433 = vmatpush.msra.mxu3 %v394_v6  ;;  %v384_v18 = vld [vmem:[#allocation5 + $0x8] sm:$0xff]  ;;  %s461_s25 = sshll.u32 %s308_s29, 4  ;;  %s463_s12 = sshll.u32 %s459_s27, 4  ;;  %s462_s25 = int_to_ptr.vmem [resolvable:$true] %s461_s25  ;;  %s464_s12 = int_to_ptr.hbm [resolvable:$true] %s463_s12 }
  0x2b   : > { %414 = vmatpush.msra.mxu2 %v391_v7  ;;  %v382_v19 = vld [vmem:[%s316_s24] sm:$0xff]  ;;  %s446_s21 = scalar_lea.sflag [#allocation4], %s956_s14  ;;  %s755_s13 = sshra.s32 %s464_s12, 4  ;;  %s756_s13 = int_to_ptr.hbm [resolvable:$true] %s755_s13 }
  0x2c   : > { %434 = vmatpush.msra.mxu3 %v392_v8  ;;  %v319_v22 = vld [vmem:[%s1021_s3] sm:$0xff]  ;;  %s757_s26 = scalar_lea.hbm %s756_s13, 16  ;;  %s761_s7 = scalar_lea.hbm %s1023_s5, 32 }
  0x2d   : > { %415 = vmatpush.msra.mxu2 %v389_v10  ;;  %p758_p1 = scmp.ne.s32.totalorder %s756_s13, %s757_s26  ;;  %p762_p11 = scmp.lt.s32.totalorder %s756_s13, %s1023_s5 }
  0x2e   : > { %435 = vmatpush.msra.mxu3 %v390_v11  ;;  %p763_p12 = scmp.lt.s32.totalorder %s761_s7, %s757_s26 }
  0x2f   : > { %416 = vmatpush.msra.mxu2 %v387_v13  ;;  %v329_v20 = vld.sshfl [vmem:[#allocation1] sm:$0xff pattern:$0x75316420]  ;;  %v330_v21 = vld.sshfl [vmem:[#allocation1 + $0x8] sm:$0xff pattern:$0x75316420]  ;;  %p759_p9 = pnand %p758_p1, %p934_p4 }
  0x30   : > { %436 = vmatpush.msra.mxu3 %v388_v14  ;;  %591 = vmatpush.msk.msra.mxu0 %vm335_vm0, %v329_v20  ;;  %p764_p13 = por %p763_p12, %p762_p11 }
  0x31   : > { %417 = vmatpush.msra.mxu2 %v385_v15  ;;  %593 = vmatpush.msk.msra.mxu1 %vm335_vm0, %v330_v21  ;;  %p760_p10 = pneg %p759_p9 }
  0x32   : > { %437 = vmatpush.msra.mxu3 %v386_v16  ;;  %592 = vmatmul.msk.f32.vlgmr.msra.gmra.mxu0 %vm331_vm2, %v319_v22 }
  0x33   : > { %418 = vmatpush.msra.mxu2 %v383_v17  ;;  %594 = vmatmul.msk.f32.vlgmr.msra.gmra.mxu1 %vm331_vm2, %v319_v22  ;;  %p765_p0 = pnand %p764_p13, %p760_p10 }
  0x34   : > { %438 = vmatpush.msra.mxu3 %v384_v18  ;;  %595 = vmatmul.msk.f32.vlgmr.msra.gmra.mxu2 %vm399_vm1, %v382_v19 }
  0x35   : > { %596 = vmatmul.msk.f32.vlgmr.msra.gmra.mxu3 %vm399_vm1, %v382_v19 }
  0x9a   : > { %v325_v23 = vpop.permute.xlu0 %324 }
  0xaf   : > { %v357_v24 = vpop.f32.mrf.mxu0 }
  0xb0   : > { %v377_v25 = vpop.f32.mrf.mxu1  ;;  %v358_v26 = vadd.f32 %v357_v24, %v325_v23 }
  0xb1   : > { %v378_v27 = vadd.f32 %v377_v25, %v325_v23 }
  0xb2   : > { %v380_v28 = vmax.f32 %v358_v26, 0.0 }
  0xb3   : > { %v381_v29 = vmax.f32 %v378_v27, 0.0 }
  0xb7   : > { %v420_v30 = vpop.f32.mrf.mxu2 }
  0xb8   : > { %v440_v31 = vpop.f32.mrf.mxu3  ;;  %v421_v32 = vadd.f32 %v420_v30, %v380_v28 }
  0xb9   : > { %v441_v33 = vadd.f32 %v440_v31, %v381_v29 }
  0xba   : > { %443 = vst [vmem:[%s308_s29] sm:$0xff] %v421_v32 }
  0xbb   : > { %444 = vst [vmem:[%s308_s29 + $0x8] sm:$0xff] %v441_v33 }
  0xbc   : > { %768 = shalt.err (!%p765_p0)
}
  0xbd   : > { %610 = dma.vmem_to_hbm [thread:$0]  (%p934_p4), %s462_s25, 256, %s464_s12, %s446_s21  }
  0xbe PF: > { %s475_s14 = sand.u32 1, %s807_s18   ;;  %p621_p2 = pnand %p582_p6, %p942_p7 }
  0xbf   : > { %s476_s11 = scalar_lea.sflag [#allocation4], %s475_s14 }
  0xc0   : > { %p622_p5 = pneg %p621_p2 }
  0xc2   : > { %802 = dma.done.wait (%p622_p5), %s476_s11, 256  }
  0xc3   : > { %804 = vsyncadd (%p622_p5), %s476_s11, 4294967040  ;;  %s22_s23 = sadd.s32 1, %s827_s23   ;;  %s1030_s18 = smov %s811_s19 }
  0xc4   : > { %p19_p8 = scmp.ge.s32.totalorder %s22_s23, 4   ;;  %s1031_s19 = smov %s815_s20 }
  0xc5   : > { %s1032_s20 = smov %s940_s16  ;;  %s1033_s21 = smov %s823_s22 }
  0xc6   : > { %s1034_s22 = smov %s1036_s10  ;;  %21 = sbr.rel (!%p19_p8) target bundleno = 7 (0x7), region = 93 }
  0xcb   :  { %482 = vsyncpa [#allocation3], 1 }
  0xcc   :  { %484 = vsyncpa [#allocation3 + $0x1], 1 }
  0xcd   :  { %485 = vsyncpa [#allocation6], 1 }
  0xce   :  { %486 = vsyncpa [#allocation4], 1 }
  0xcf   :  { %488 = vsyncpa [#allocation4 + $0x1], 1 }

</bundles_post_ra>
